<compile_context>
chip_gen: v7x
topology: tpu7x:2x2x1
jax: 0.10.0
libtpu: 0.0.40
codegen_flags: <defaults>
</compile_context>

<pallas_src>
import jax
import jax.numpy as jnp
from jax import lax
from jax.experimental import pallas as pl
from jax.experimental.pallas import tpu as pltpu


def _round_up(x, m):
    return ((x + m - 1) // m) * m


def patch_matmul_kernel(p_ref, w_ref, o_ref):
    # p_ref: (TILE_M, K) bf16   w_ref: (K, E_pad) bf16   o_ref: (TILE_M, E_pad) f32
    # Single lane-dense store of the f32 MXU accumulation.
    o_ref[...] = jnp.dot(p_ref[...], w_ref[...],
                         preferred_element_type=jnp.float32)


def patch_embedding_forward(x, conv_w, conv_b, cls_tkn_embd, pos_embd, patch_size):
    """x: (B, C, H, W) float32. Returns (B, N+1, E) matching the PyTorch module."""
    B, C, H, W = x.shape
    E = conv_w.shape[0]
    P = patch_size
    Hp, Wp = H // P, W // P
    N = Hp * Wp
    K = C * P * P
    M = B * N

    # --- glue: im2col in bf16 (halves bytes of the extra HBM pass), flatten
    #     batch into the M dimension, (c, ph, pw) order matching the weight.
    # TODO(synk): with allow_input_fusion the transpose could fuse into the
    #             kernel's input DMA and remove this pass entirely.
    xb = x.astype(jnp.bfloat16)
    patches = xb.reshape(B, C, Hp, P, Wp, P)
    patches = patches.transpose(0, 2, 4, 1, 3, 5).reshape(M, K)      # (B*N, K) bf16

    # Weight (E, C, P, P) -> (K, E), bf16, lane dim padded to a multiple of 128
    # so every output store is an unmasked dense vst.
    E_pad = _round_up(E, 128)
    w2d = conv_w.reshape(E, K).T.astype(jnp.bfloat16)                # (K, E)
    if E_pad != E:
        w2d = jnp.pad(w2d, ((0, 0), (0, E_pad - E)))                 # (K, E_pad)

    # M tiling: big tiles for the MXU; ragged last tile is masked by Pallas.
    TILE_M = 256 if M >= 256 else M
    grid = (pl.cdiv(M, TILE_M),)

    out = pl.pallas_call(
        patch_matmul_kernel,
        out_shape=jax.ShapeDtypeStruct((M, E_pad), jnp.float32),
        grid_spec=pltpu.PrefetchScalarGridSpec(
            num_scalar_prefetch=0,
            grid=grid,
            in_specs=[
                pl.BlockSpec((TILE_M, K), lambda i: (i, 0)),         # patch rows
                pl.BlockSpec((K, E_pad), lambda i: (0, 0)),          # weight (resident)
            ],
            out_specs=pl.BlockSpec((TILE_M, E_pad), lambda i: (i, 0)),
        ),
        compiler_params=pltpu.CompilerParams(
            dimension_semantics=("parallel",),
            vmem_limit_bytes=32 * 1024 * 1024,
        ),
    )(patches, w2d)

    # --- wrapper-side epilogue (single fused XLA pass, all in f32):
    #     bias folded into pos rows 0..N-1, cls row (+ pos[N]) appended at END.
    emb = out[:, :E].reshape(B, N, E)                                # (B, N, E) f32
    pos = pos_embd.reshape(N + 1, E).astype(jnp.float32)
    patch_tokens = emb + (pos[:N] + conv_b.reshape(1, E))[None]      # (B, N, E)
    cls_row = cls_tkn_embd.astype(jnp.float32) + pos[N][None, None, :]  # (B, 1, E)
    y = jnp.concatenate([patch_tokens, cls_row], axis=1)             # (B, N+1, E)
    return y.astype(x.dtype)


def reference_forward(x, conv_w, conv_b, cls_tkn_embd, pos_embd, patch_size):
    """Pure-JAX f32 reference matching the PyTorch module."""
    P = patch_size
    y = lax.conv_general_dilated(
        x, conv_w, window_strides=(P, P), padding="VALID",
        dimension_numbers=("NCHW", "OIHW", "NCHW"))                  # (B, E, Hp, Wp)
    y = y + conv_b.reshape(1, -1, 1, 1)
    B, E = y.shape[0], y.shape[1]
    y = y.reshape(B, E, -1).transpose(0, 2, 1)                       # (B, N, E)
    y = jnp.concatenate([y, cls_tkn_embd], axis=1)                   # cls at END
    y = y + pos_embd
    return y


if __name__ == "__main__":
    # Small shapes consistent with the module.
    batch_size = 2
    input_channels = 4
    spatial = 16
    patch_size = 4
    embedding_size = 32
    num_patches = (spatial // patch_size) ** 2                       # 16
    dtype = jnp.float32

    key = jax.random.PRNGKey(0)
    kx, kw, kb, kc, kp = jax.random.split(key, 5)

    x = jax.random.normal(kx, (batch_size, input_channels, spatial, spatial), dtype)
    # Conv2d(in=C, out=E, kernel=P, stride=P): weight (E, C, P, P), bias (E,)
    conv_w = jax.random.normal(kw, (embedding_size, input_channels, patch_size, patch_size), dtype) * 0.05
    conv_b = jax.random.normal(kb, (embedding_size,), dtype) * 0.05
    cls_tkn_embd = jax.random.normal(kc, (batch_size, 1, embedding_size), dtype)
    pos_embd = jax.random.normal(kp, (1, num_patches + 1, embedding_size), dtype)

    out = patch_embedding_forward(x, conv_w, conv_b, cls_tkn_embd, pos_embd, patch_size)
    out = jax.block_until_ready(out)

    ref = reference_forward(x, conv_w, conv_b, cls_tkn_embd, pos_embd, patch_size)
    assert out.shape == (batch_size, num_patches + 1, embedding_size)
    # bf16 matmul operands (f32 accumulation) -> looser tolerance than pure f32.
    assert jnp.allclose(out, ref, atol=3e-2, rtol=3e-2), "mismatch vs reference"

    print("KERNEL_OK")
</pallas_src>

<mosaic_0001>
module attributes {stable_mosaic.version = 11 : i64} {
  func.func @patch_matmul_kernel(%arg0: i32, %arg1: memref<32x64xbf16, #tpu.memory_space<vmem>>, %arg2: memref<64x128xbf16, #tpu.memory_space<vmem>>, %arg3: memref<32x128xf32, #tpu.memory_space<vmem>>) attributes {dimension_semantics = [#tpu.dimension_semantics<parallel>], iteration_bounds = array<i64: 1>, scalar_prefetch = 0 : i64, scratch_operands = 0 : i64, tpu.core_type = #tpu.core_type<tc>, window_params = [{transform_indices = @transform_0, window_bounds = array<i64: 32, 64>}, {pipeline_mode = #tpu.pipeline_mode<synchronous>, transform_indices = @transform_1, window_bounds = array<i64: 64, 128>}, {transform_indices = @transform_2, window_bounds = array<i64: 32, 128>}]} {
    %c0 = arith.constant 0 : index
    %c0_0 = arith.constant 0 : index
    %0 = vector.load %arg1[%c0, %c0_0] : memref<32x64xbf16, #tpu.memory_space<vmem>>, vector<32x64xbf16>
    %c0_1 = arith.constant 0 : index
    %c0_2 = arith.constant 0 : index
    %1 = vector.load %arg2[%c0_1, %c0_2] : memref<64x128xbf16, #tpu.memory_space<vmem>>, vector<64x128xbf16>
    %cst = arith.constant dense<0.000000e+00> : vector<32x128xf32>
    %2 = tpu.matmul %0, %1, %cst {dimension_numbers = #tpu.dot_dimension_numbers<[1], [0], [0], [1], [0, 0, 1, 1], [], []>} : vector<32x64xbf16>, vector<64x128xbf16>, vector<32x128xf32> -> vector<32x128xf32>
    %c0_3 = arith.constant 0 : index
    %c0_4 = arith.constant 0 : index
    %3 = vector.load %arg3[%c0_3, %c0_4] : memref<32x128xf32, #tpu.memory_space<vmem>>, vector<32x128xf32>
    tpu.vector_store %arg3[%c0_3, %c0_4], %2 {strides = array<i32>} : memref<32x128xf32, #tpu.memory_space<vmem>>, vector<32x128xf32>,
    return
  }
  func.func @transform_0(%arg0: i32) -> (i32, i32) {
    %c0_i32 = arith.constant 0 : i32
    %c0_i32_0 = arith.constant 0 : i32
    return %arg0, %c0_i32 : i32, i32
  }
  func.func @transform_1(%arg0: i32) -> (i32, i32) {
    %c0_i32 = arith.constant 0 : i32
    %c0_i32_0 = arith.constant 0 : i32
    %c0_i32_1 = arith.constant 0 : i32
    return %c0_i32, %c0_i32_0 : i32, i32
  }
  func.func @transform_2(%arg0: i32) -> (i32, i32) {
    %c0_i32 = arith.constant 0 : i32
    %c0_i32_0 = arith.constant 0 : i32
    return %arg0, %c0_i32 : i32, i32
  }
}

</mosaic_0001>

<bundles_post_ra>
// kernel: tpu_custom_call.1
= control target key start
LH: loop header
LB: loop body
LE: loop exit
PB: predicated region body
PF: predicated region fallthrough
CT: control target
= control target key end

     0   :  { %7 = vsyncpa [#allocation3], 0  ;;  %s334_s0 = inlined_call_operand.hbm [shape: bf16[32,64], index: 0, kind: input, shape index: {}]   ;;  %s335_s1 = inlined_call_operand.hbm [shape: bf16[64,128], index: 1, kind: input, shape index: {}]   ;;  %s336_s2 = inlined_call_operand.hbm [shape: f32[32,128], index: 2, kind: output, shape index: {}]  }
   0x1   :  { %8 = vsyncpa [#allocation6], 0 }
   0x2   :  { %9 = vsyncpa [#allocation4], 0  ;;  %s276_s9 = smov [#allocation2]   ;;  %s204_s13 = scalar_lea.hbm %s334_s0, 256 }
   0x3   :  { %s15_s10 = sshll.u32 %s276_s9, 4  ;;  %p205_p0 = scmp.ne.s32.totalorder %s334_s0, %s204_s13  ;;  %s16_s10 = int_to_ptr.vmem [resolvable:$true] %s15_s10 }
   0x4   :  { %p208_p1 = scmp.lt.u32.totalorder %s204_s13, %s334_s0 }
   0x6   :  { %p210_p2 = pnand %p208_p1, %p205_p0 }
   0x8   :  { %213 = shalt.err (!%p210_p2)
}
   0x9   :  { %s214_s18 = scalar_lea.vmem %s16_s10, 256  ;;  %p219_p4 = scmp.lt.s32.totalorder %s16_s10, %s16_s10 }
   0xa   :  { %p215_p3 = scmp.ne.s32.totalorder %s16_s10, %s214_s18  ;;  %p220_p5 = scmp.lt.s32.totalorder %s214_s18, %s214_s18 }
   0xc   :  { %p221_p6 = por %p220_p5, %p219_p4 }
   0xe   :  { %p222_p7 = pnand %p221_p6, %p215_p3 }
  0x10   :  { %225 = shalt.err (!%p222_p7)
}
  0x11   :  { %s277_s19 = smov 64   ;;  %s278_s20 = smov 4  }
  0x12   :  { %21 = dma.hbm_to_vmem [thread:$0]  %s334_s0, 256, %s16_s10, [#allocation3], %s277_s19, %s277_s19, %s278_s20  }
  0x13   :  { %s279_s23 = smov [#allocation5]   ;;  %s226_s27 = scalar_lea.hbm %s335_s1, 512 }
  0x14   :  { %s27_s24 = sshll.u32 %s279_s23, 4  ;;  %p227_p8 = scmp.ne.s32.totalorder %s335_s1, %s226_s27  ;;  %s28_s24 = int_to_ptr.vmem [resolvable:$true] %s27_s24 }
  0x15   :  { %p230_p9 = scmp.lt.u32.totalorder %s226_s27, %s335_s1 }
  0x17   :  { %p232_p10 = pnand %p230_p9, %p227_p8 }
  0x19   :  { %235 = shalt.err (!%p232_p10)
}
  0x1a   :  { %s236_s4 = scalar_lea.vmem %s28_s24, 512  ;;  %p241_p12 = scmp.lt.s32.totalorder %s28_s24, %s28_s24 }
  0x1b   :  { %p237_p11 = scmp.ne.s32.totalorder %s28_s24, %s236_s4  ;;  %p242_p13 = scmp.lt.s32.totalorder %s236_s4, %s236_s4 }
  0x1d   :  { %p243_p0 = por %p242_p13, %p241_p12 }
  0x1f   :  { %p244_p1 = pnand %p243_p0, %p237_p11 }
  0x21   :  { %247 = shalt.err (!%p244_p1)
}
  0x22   :  { %33 = dma.hbm_to_vmem [thread:$0]  %s335_s1, 512, %s28_s24, [#allocation6], %s277_s19, %s277_s19, %s278_s20  }
  0x23   :  { %270 = dma.done.wait [#allocation3], 256  }
  0x24   :  { %271 = vsyncadd [#allocation3], 4294967040 }
  0x25   :  { %272 = dma.done.wait [#allocation6], 512  }
  0x26   :  { %273 = vsyncadd [#allocation6], 4294966784  ;;  %v198_v0 = vld [vmem:[#allocation5] sm:$0xff]   ;;  %v199_v1 = vld [vmem:[#allocation5 + $0x8] sm:$0xff]   ;;  %vm87_vm0 = vcmask 523264   ;;  %s280_s1 = smov [#allocation7]  }
  0x27   :  { %179 = vmatprep.subr.bf16.mxu0 %v198_v0  ;;  %v200_v2 = vld [vmem:[#allocation5 + $0x10] sm:$0xff]   ;;  %v201_v4 = vld [vmem:[#allocation5 + $0x18] sm:$0xff]   ;;  %s152_s6 = sshll.u32 %s280_s1, 4  ;;  %s153_s6 = int_to_ptr.vmem [resolvable:$true] %s152_s6 }
  0x28   :  { %180 = vmatpush3.bf16.msra.mxu0 %v198_v0  ;;  %v202_v3 = vld [vmem:[#allocation2] sm:$0xff]   ;;  %v203_v5 = vld [vmem:[#allocation2 + $0x8] sm:$0xff]   ;;  %s248_s7 = scalar_lea.vmem %s153_s6, 512  ;;  %p253_p3 = scmp.lt.s32.totalorder %s153_s6, %s153_s6 }
  0x29   :  { %181 = vmatprep.subr.bf16.mxu0 %v199_v1  ;;  %187 = vmatprep.mubr.msk.bf16.mxu0 %vm87_vm0, %v202_v3  ;;  %p249_p2 = scmp.ne.s32.totalorder %s153_s6, %s248_s7  ;;  %p254_p4 = scmp.lt.s32.totalorder %s248_s7, %s248_s7 }
  0x2b   :  { %p255_p5 = por %p254_p4, %p253_p3 }
  0x2c   :  { %182 = vmatpush3.bf16.msra.mxu0 %v199_v1 }
  0x2d   :  { %183 = vmatprep.subr.bf16.mxu0 %v200_v2  ;;  %p256_p6 = pnand %p255_p5, %p249_p2 }
  0x30   :  { %184 = vmatpush3.bf16.msra.mxu0 %v200_v2 }
  0x31   :  { %185 = vmatprep.subr.bf16.mxu0 %v201_v4 }
  0x34   :  { %186 = vmatpush3.bf16.msra.mxu0 %v201_v4 }
  0x37   :  { %188 = vmatmul.mubr.msk.bf16.vlgmr.msra.gmra.mrb[0].mxu0 %vm87_vm0, %v203_v5 }
 0x10a   :  { %v189_v6 = vpop.f32.mrb[0].mxu0 }
 0x10b   :  { %145 = vst [vmem:[#allocation7 + $0x10] sm:$0xff] %v189_v6  ;;  %v128_v7 = vpop.f32.mrb[1].mxu0 }
 0x10c   :  { %143 = vst [vmem:[#allocation7] sm:$0xff] %v128_v7  ;;  %v190_v8 = vpop.f32.mrb[2].mxu0 }
 0x10d   :  { %146 = vst [vmem:[#allocation7 + $0x18] sm:$0xff] %v190_v8  ;;  %v131_v9 = vpop.f32.mrb[3].mxu0 }
 0x10e   :  { %144 = vst [vmem:[#allocation7 + $0x8] sm:$0xff] %v131_v9 }
 0x10f   :  { %259 = shalt.err (!%p256_p6)
}
 0x110   :  { %s260_s10 = scalar_lea.hbm %s336_s2, 512 }
 0x111   :  { %p261_p7 = scmp.ne.s32.totalorder %s336_s2, %s260_s10  ;;  %p264_p8 = scmp.lt.u32.totalorder %s260_s10, %s336_s2 }
 0x113   :  { %p266_p9 = pnand %p264_p8, %p261_p7 }
 0x115   :  { %269 = shalt.err (!%p266_p9)
}
 0x116   :  { %s281_s15 = smov 128   ;;  %s282_s16 = smov 8  }
 0x117   :  { %158 = dma.vmem_to_hbm [thread:$0]  %s153_s6, 512, %s336_s2, [#allocation4], %s281_s15, %s281_s15, %s282_s16  }
 0x118   :  { %274 = dma.done.wait [#allocation4], 512  }
 0x119   :  { %275 = vsyncadd [#allocation4], 4294966784 }
 0x11a   :  { %162 = vsyncpa [#allocation3], 1 }
 0x11b   :  { %163 = vsyncpa [#allocation6], 1 }
 0x11c   :  { %164 = vsyncpa [#allocation4], 1 }

</bundles_post_ra>
